<compile_context>
chip_gen: v5e
topology: v5e:2x2
jax: 0.10.0
libtpu: 0.0.40
codegen_flags: <defaults>
</compile_context>

<pallas_src>
import functools

import jax
import jax.numpy as jnp
from jax.experimental import pallas as pl
from jax.experimental.pallas import tpu as pltpu


# Scoped VMEM cap: above every generation's default (16/32 MiB), below v7x's 64 MiB physical.
_VMEM_LIMIT_BYTES = 48 * 1024 * 1024


def _pick_block(dim, preferred, align):
    """Block size for `dim`: full dim if it already fits `preferred`, otherwise the largest
    `align`-multiple divisor of `dim` that is <= preferred.  Falls back to the full dim rather
    than emitting a non-(8,128)-aligned tile (masked stores / layout padding)."""
    if dim <= preferred:
        return dim
    b = (preferred // align) * align
    while b >= align:
        if dim % b == 0:
            return b
        b -= align
    return dim


def _pick_divisor(dim, preferred):
    """Largest divisor of `dim` <= preferred (for leading/grid-only dims, no alignment needed)."""
    b = min(dim, preferred)
    while dim % b:
        b -= 1
    return b


def _pick_batch_block(B, b_pref):
    if B > b_pref:
        return _pick_block(B, b_pref, 8)
    # Prefer >=2 batch blocks so the "parallel" batch axis can actually split across both
    # TensorCores on v7x (only when B allows a sublane-aligned split).
    if B >= 16 and B % 16 == 0:
        return B // 2
    return B


# ---------------------------------------------------------------------------
# Stages 1 & 3: big fully-parallel matmul against an (N, K) weight (contract on last dims).
# ---------------------------------------------------------------------------
def _matmul_nt_bias_kernel(x_ref, w_ref, b_ref, o_ref):
    acc = jax.lax.dot_general(x_ref[...], w_ref[...],
                              (((1,), (1,)), ((), ())),
                              preferred_element_type=jnp.float32)
    o_ref[...] = (acc + b_ref[...]).astype(o_ref.dtype)


def _matmul_nt_kernel(x_ref, w_ref, o_ref):
    o_ref[...] = jax.lax.dot_general(x_ref[...], w_ref[...],
                                     (((1,), (1,)), ((), ())),
                                     preferred_element_type=jnp.float32
                                     ).astype(o_ref.dtype)


def matmul_nt(x, w, bias=None, *, out_dtype=jnp.float32, tm_pref=512, tn_pref=512):
    """(M, K) @ (N, K)^T [+ bias(1, N)] -> (M, N) in `out_dtype`.

    The weight stays in its native (N, K) layout (e.g. torch's (out_features, in_features));
    the MXU handles the transposed RHS natively, so no wrapper-side transpose / HBM round trip.
    Grid tiled over M and N, both parallel; K kept whole inside the block.
    """
    M, K = x.shape
    N, K2 = w.shape
    assert K == K2
    tm = _pick_block(M, tm_pref, 8)     # sublane-aligned (or full-M) tiles
    tn = _pick_block(N, tn_pref, 128)   # lane-dense output tiles (or full N)

    in_specs = [
        pl.BlockSpec((tm, K), lambda i, j: (i, 0)),
        pl.BlockSpec((tn, K), lambda i, j: (j, 0)),
    ]
    operands = [x, w]
    kernel = _matmul_nt_kernel
    if bias is not None:
        in_specs.append(pl.BlockSpec((1, tn), lambda i, j: (0, j)))
        operands.append(bias.astype(jnp.float32).reshape(1, N))
        kernel = _matmul_nt_bias_kernel

    grid_spec = pltpu.PrefetchScalarGridSpec(
        num_scalar_prefetch=0,
        grid=(M // tm, N // tn),
        in_specs=in_specs,
        out_specs=pl.BlockSpec((tm, tn), lambda i, j: (i, j)),
    )
    return pl.pallas_call(
        kernel,
        out_shape=jax.ShapeDtypeStruct((M, N), out_dtype),
        grid_spec=grid_spec,
        compiler_params=pltpu.CompilerParams(
            dimension_semantics=("parallel", "parallel"),
            vmem_limit_bytes=_VMEM_LIMIT_BYTES),
    )(*operands)


# ---------------------------------------------------------------------------
# Stage 2: serial LSTM recurrence.  Emits h_{t-1} (the "shifted" outputs).
# ---------------------------------------------------------------------------
def lstm_recurrence_kernel(gx_ref, whh_ref, hshift_ref, h_sc, c_sc, *, unroll):
    # gx_ref:    (T, Bblk, 4H)  precomputed x-gates (bias folded in), compute dtype (bf16/f32)
    # whh_ref:   (4H, H)        recurrent weights, native torch layout, compute dtype
    # hshift_ref:(T, Bblk, H)   output: h_{t-1} for each timestep in the block, compute dtype
    # h_sc/c_sc: (Bblk, H) f32  persistent state across the (sequential) time grid axis
    H = whh_ref.shape[1]

    @pl.when(pl.program_id(1) == 0)      # start of each batch block's time sweep
    def _():
        h_sc[...] = jnp.zeros_like(h_sc)
        c_sc[...] = jnp.zeros_like(c_sc)

    w = whh_ref[...]                     # hoisted, resident across the inner loop
    block_t = gx_ref.shape[0]

    def step(t, carry):
        h_prev, c_prev = carry           # f32 state; elementwise math stays f32 (v5e-safe)
        # shifted_outputs[t] = h_{t-1}  (h_{-1} = h0 = 0)
        hshift_ref[t] = h_prev.astype(hshift_ref.dtype)
        # ONE fused recurrent dot: (Bblk, H) x (4H, H)^T -> (Bblk, 4H), bf16 operands, f32 acc.
        pre = gx_ref[t].astype(jnp.float32) + jax.lax.dot_general(
            h_prev.astype(w.dtype), w, (((1,), (1,)), ((), ())),
            preferred_element_type=jnp.float32)
        # PyTorch gate order along the 4H lane axis: i | f | g | o (lane-aligned when H % 128 == 0).
        i_g = jax.nn.sigmoid(pre[:, 0 * H:1 * H])
        f_g = jax.nn.sigmoid(pre[:, 1 * H:2 * H])
        g_g = jnp.tanh(pre[:, 2 * H:3 * H])
        o_g = jax.nn.sigmoid(pre[:, 3 * H:4 * H])
        c_new = f_g * c_prev + i_g * g_g
        h_new = o_g * jnp.tanh(c_new)
        return h_new, c_new

    h_last, c_last = jax.lax.fori_loop(
        0, block_t, step, (h_sc[...], c_sc[...]), unroll=unroll)
    h_sc[...] = h_last
    c_sc[...] = c_last


def lstm_recurrence(gates_x, w_hh, hidden, *, out_dtype, t_pref=8, b_pref=128, unroll=2):
    """gates_x: (S, B, 4H) compute dtype, w_hh: (4H, H) compute dtype -> h_shifted (S, B, H)."""
    S, B, G4H = gates_x.shape
    H = hidden
    assert G4H == 4 * H

    block_t = _pick_divisor(S, t_pref)    # T timesteps per grid step (amortizes grid overhead)
    block_b = _pick_batch_block(B, b_pref)

    grid_spec = pltpu.PrefetchScalarGridSpec(
        num_scalar_prefetch=0,
        # NOTE: grid order must stay (batch outer, time inner): the h/c scratch carry relies on
        # the time axis being the innermost sequential sweep per batch block.
        grid=(B // block_b, S // block_t),
        in_specs=[
            pl.BlockSpec((block_t, block_b, 4 * H), lambda b, s: (s, b, 0)),
            pl.BlockSpec((4 * H, H), lambda b, s: (0, 0)),        # resident recurrent weights
        ],
        out_specs=pl.BlockSpec((block_t, block_b, H), lambda b, s: (s, b, 0)),
        scratch_shapes=[pltpu.VMEM((block_b, H), jnp.float32),    # h state (f32)
                        pltpu.VMEM((block_b, H), jnp.float32)],   # c state (f32)
    )
    return pl.pallas_call(
        functools.partial(lstm_recurrence_kernel, unroll=unroll),
        out_shape=jax.ShapeDtypeStruct((S, B, H), out_dtype),
        grid_spec=grid_spec,
        compiler_params=pltpu.CompilerParams(
            # batch blocks independent -> parallel; time carries state -> arbitrary (innermost)
            dimension_semantics=("parallel", "arbitrary"),
            vmem_limit_bytes=_VMEM_LIMIT_BYTES),
    )(gates_x, w_hh)


# ---------------------------------------------------------------------------
# Full forward
# ---------------------------------------------------------------------------
def bare_lstm_encoder_forward(tokens, emb_w, w_ih, w_hh, b_ih, b_hh,
                              *, compute_dtype=jnp.bfloat16):
    """tokens: (S, B) int32 token ids.  Returns logits (S, B, V) float32."""
    S, B = tokens.shape
    V, H = emb_w.shape

    # One-time small weight casts (no per-stage astype of the big activations).
    emb_c = emb_w.astype(compute_dtype)       # used for the gather AND the tied projection
    w_ih_c = w_ih.astype(compute_dtype)       # native (4H, H) layout, no transpose
    w_hh_c = w_hh.astype(compute_dtype)       # native (4H, H) layout, no transpose
    bias = (b_ih + b_hh).astype(jnp.float32)  # (4H,)

    # Embedding gather kept as plain-JAX glue (already emits compute_dtype => half the HBM traffic).
    # TODO(synk): fuse the gather into stage 1 via scalar-prefetched token ids driving a DMA row
    #             gather, or gather a precomputed (V, 4H) gate table when S*B >> V.
    x_emb = emb_c[tokens]                                          # (S, B, H) compute_dtype

    # Stage 1: hoisted input->gates matmul as ONE big MXU matmul; gates emitted in compute_dtype.
    gates = matmul_nt(x_emb.reshape(S * B, H), w_ih_c, bias,
                      out_dtype=compute_dtype, tm_pref=512, tn_pref=512)   # (S*B, 4H)
    gates = gates.reshape(S, B, 4 * H)                             # free reshape, no transpose

    # Stage 2: serial recurrence; only the fused h @ W_hh^T dot stays on the critical path.
    h_shifted = lstm_recurrence(gates, w_hh_c, H, out_dtype=compute_dtype)  # (S, B, H), row t = h_{t-1}

    # Stage 3: hoisted tied-weight projection (Linear, bias=False) as ONE big MXU matmul.
    logits = matmul_nt(h_shifted.reshape(S * B, H), emb_c, None,
                       out_dtype=jnp.float32, tm_pref=512, tn_pref=512)     # (S*B, V) f32
    return logits.reshape(S, B, V)


# ---------------------------------------------------------------------------
# Pure-JAX reference mirroring the PyTorch forward (f32 throughout).
# ---------------------------------------------------------------------------
def reference_forward(tokens, emb_w, w_ih, w_hh, b_ih, b_hh):
    S, B = tokens.shape
    V, H = emb_w.shape
    x_emb = emb_w[tokens].astype(jnp.float32)

    def step(carry, x):
        h, c = carry
        gates = x @ w_ih.T + h @ w_hh.T + b_ih + b_hh
        i = jax.nn.sigmoid(gates[:, :H])
        f = jax.nn.sigmoid(gates[:, H:2 * H])
        g = jnp.tanh(gates[:, 2 * H:3 * H])
        o = jax.nn.sigmoid(gates[:, 3 * H:])
        c = f * c + i * g
        h = o * jnp.tanh(c)
        return (h, c), h

    h0 = jnp.zeros((B, H), jnp.float32)
    _, outs = jax.lax.scan(step, (h0, h0), x_emb)
    shifted = jnp.concatenate([h0[None], outs[:-1]], axis=0)   # torch.cat((h0, outputs[:-1]), 0)
    return shifted @ emb_w.T                                   # tied-weight Linear, no bias


if __name__ == "__main__":
    # config: back_input_size = H, n_embed = V
    S, B, H, V = 8, 2, 32, 64

    key = jax.random.PRNGKey(0)
    k_tok, k_emb, k_wih, k_whh, k_bih, k_bhh = jax.random.split(key, 6)

    tokens = jax.random.randint(k_tok, (S, B), 0, V, dtype=jnp.int32)   # batch.hypothesis (seq, batch)
    bound = 1.0 / jnp.sqrt(H)
    emb_w = jax.random.normal(k_emb, (V, H), jnp.float32)               # nn.Embedding weight (== out.weight)
    w_ih = jax.random.uniform(k_wih, (4 * H, H), jnp.float32, -bound, bound)
    w_hh = jax.random.uniform(k_whh, (4 * H, H), jnp.float32, -bound, bound)
    b_ih = jax.random.uniform(k_bih, (4 * H,), jnp.float32, -bound, bound)
    b_hh = jax.random.uniform(k_bhh, (4 * H,), jnp.float32, -bound, bound)

    ref = jax.block_until_ready(reference_forward(tokens, emb_w, w_ih, w_hh, b_ih, b_hh))

    # Strict semantic check: f32 compute path.
    logits_f32 = jax.block_until_ready(
        bare_lstm_encoder_forward(tokens, emb_w, w_ih, w_hh, b_ih, b_hh,
                                  compute_dtype=jnp.float32))
    assert logits_f32.shape == (S, B, V), logits_f32.shape
    assert jnp.allclose(logits_f32, ref, atol=1e-3, rtol=1e-3), \
        float(jnp.abs(logits_f32 - ref).max())

    # Fast path: bf16 MXU operands (including the recurrent dot) with f32 accumulation.
    logits_bf16 = jax.block_until_ready(
        bare_lstm_encoder_forward(tokens, emb_w, w_ih, w_hh, b_ih, b_hh,
                                  compute_dtype=jnp.bfloat16))
    assert logits_bf16.shape == (S, B, V), logits_bf16.shape
    assert jnp.allclose(logits_bf16, ref, atol=3e-1, rtol=5e-2), \
        float(jnp.abs(logits_bf16 - ref).max())

    print("KERNEL_OK")
</pallas_src>

<mosaic_0001>
module attributes {stable_mosaic.version = 11 : i64} {
  func.func @_matmul_nt_bias_kernel(%arg0: i32, %arg1: i32, %arg2: memref<16x32xf32, #tpu.memory_space<vmem>>, %arg3: memref<128x32xf32, #tpu.memory_space<vmem>>, %arg4: memref<1x128xf32, #tpu.memory_space<vmem>>, %arg5: memref<16x128xf32, #tpu.memory_space<vmem>>) attributes {dimension_semantics = [#tpu.dimension_semantics<parallel>, #tpu.dimension_semantics<parallel>], iteration_bounds = array<i64: 1, 1>, scalar_prefetch = 0 : i64, scratch_operands = 0 : i64, tpu.core_type = #tpu.core_type<tc>, window_params = [{transform_indices = @transform_0, window_bounds = array<i64: 16, 32>}, {transform_indices = @transform_1, window_bounds = array<i64: 128, 32>}, {transform_indices = @transform_2, window_bounds = array<i64: 1, 128>}, {transform_indices = @transform_3, window_bounds = array<i64: 16, 128>}]} {
    %c0 = arith.constant 0 : index
    %c0_0 = arith.constant 0 : index
    %0 = vector.load %arg2[%c0, %c0_0] : memref<16x32xf32, #tpu.memory_space<vmem>>, vector<16x32xf32>
    %c0_1 = arith.constant 0 : index
    %c0_2 = arith.constant 0 : index
    %1 = vector.load %arg3[%c0_1, %c0_2] : memref<128x32xf32, #tpu.memory_space<vmem>>, vector<128x32xf32>
    %cst = arith.constant dense<0.000000e+00> : vector<16x128xf32>
    %2 = tpu.matmul %0, %1, %cst {dimension_numbers = #tpu.dot_dimension_numbers<[1], [1], [0], [0], [0, 0, 1, 0], [], []>} : vector<16x32xf32>, vector<128x32xf32>, vector<16x128xf32> -> vector<16x128xf32>
    %c0_3 = arith.constant 0 : index
    %c0_4 = arith.constant 0 : index
    %3 = vector.load %arg4[%c0_3, %c0_4] : memref<1x128xf32, #tpu.memory_space<vmem>>, vector<1x128xf32>
    %4 = vector.broadcast %3 : vector<1x128xf32> to vector<16x128xf32>
    %5 = arith.addf %2, %4 : vector<16x128xf32>
    %c0_5 = arith.constant 0 : index
    %c0_6 = arith.constant 0 : index
    %6 = vector.load %arg5[%c0_5, %c0_6] : memref<16x128xf32, #tpu.memory_space<vmem>>, vector<16x128xf32>
    tpu.vector_store %arg5[%c0_5, %c0_6], %5 {strides = array<i32>} : memref<16x128xf32, #tpu.memory_space<vmem>>, vector<16x128xf32>,
    return
  }
  func.func @transform_0(%arg0: i32, %arg1: i32) -> (i32, i32) {
    %c0_i32 = arith.constant 0 : i32
    %c0_i32_0 = arith.constant 0 : i32
    return %arg0, %c0_i32 : i32, i32
  }
  func.func @transform_1(%arg0: i32, %arg1: i32) -> (i32, i32) {
    %c0_i32 = arith.constant 0 : i32
    %c0_i32_0 = arith.constant 0 : i32
    return %arg1, %c0_i32 : i32, i32
  }
  func.func @transform_2(%arg0: i32, %arg1: i32) -> (i32, i32) {
    %c0_i32 = arith.constant 0 : i32
    %c0_i32_0 = arith.constant 0 : i32
    return %c0_i32, %arg1 : i32, i32
  }
  func.func @transform_3(%arg0: i32, %arg1: i32) -> (i32, i32) {
    %c0_i32 = arith.constant 0 : i32
    return %arg0, %arg1 : i32, i32
  }
}

</mosaic_0001>

<bundles_post_ra>
// kernel: tpu_custom_call.1
= control target key start
LH: loop header
LB: loop body
LE: loop exit
PB: predicated region body
PF: predicated region fallthrough
CT: control target
= control target key end

     0   :  { %vm37_vm0 = vcmask 261120   ;;  %s316_s0 = inlined_call_operand.vmem [shape: f32[16,32], index: 0, kind: input, shape index: {}]   ;;  %s317_s1 = inlined_call_operand.vmem [shape: f32[128,32], index: 1, kind: input, shape index: {}]   ;;  %s318_s2 = inlined_call_operand.vmem [shape: f32[1,128], index: 2, kind: input, shape index: {}]   ;;  %s319_s3 = inlined_call_operand.hbm [shape: f32[16,128], index: 3, kind: output, shape index: {}]  }
   0x1   :  { %v32_v0 = vld [vmem:[%s317_s1 + $0x78] sm:$0xff]  ;;  %v31_v1 = vld [vmem:[%s317_s1 + $0x70] sm:$0xff] }
   0x2   :  { %135 = vmatpush.xpose.msk.msra.mxu0 %vm37_vm0, %v32_v0  ;;  %153 = vmatpush.xpose.msk.msra.mxu1 %vm37_vm0, %v32_v0 }
   0x3   :  { %8 = vsyncpa [#allocation3], 0  ;;  %v30_v2 = vld [vmem:[%s317_s1 + $0x68] sm:$0xff]  ;;  %v29_v3 = vld [vmem:[%s317_s1 + $0x60] sm:$0xff]  ;;  %s123_s26 = sshll.u32 %s319_s3, 4  ;;  %s201_s27 = smov 8   ;;  %s124_s26 = int_to_ptr.hbm [resolvable:$true] %s123_s26 }
   0x4   :  { %v28_v4 = vld [vmem:[%s317_s1 + $0x58] sm:$0xff]  ;;  %v27_v5 = vld [vmem:[%s317_s1 + $0x50] sm:$0xff]  ;;  %v26_v6 = vld [vmem:[%s317_s1 + $0x48] sm:$0xff] }
   0x5   :  { %v25_v7 = vld [vmem:[%s317_s1 + $0x40] sm:$0xff]  ;;  %v24_v8 = vld [vmem:[%s317_s1 + $0x38] sm:$0xff]  ;;  %v23_v9 = vld [vmem:[%s317_s1 + $0x30] sm:$0xff] }
   0x6   :  { %136 = vmatpush.xpose.msk.msra.mxu0 %vm37_vm0, %v31_v1  ;;  %154 = vmatpush.xpose.msk.msra.mxu1 %vm37_vm0, %v31_v1  ;;  %v22_v10 = vld [vmem:[%s317_s1 + $0x28] sm:$0xff]  ;;  %v21_v11 = vld [vmem:[%s317_s1 + $0x20] sm:$0xff]  ;;  %v20_v12 = vld [vmem:[%s317_s1 + $0x18] sm:$0xff] }
   0x7   :  { %v19_v13 = vld [vmem:[%s317_s1 + $0x10] sm:$0xff]  ;;  %v18_v14 = vld [vmem:[%s317_s1 + $0x8] sm:$0xff]  ;;  %v17_v15 = vld [vmem:[%s317_s1] sm:$0xff]  ;;  %s199_s1 = smov [#allocation2]  }
   0x8   :  { %v15_v16 = vld [vmem:[%s316_s0] sm:$0xff]  ;;  %v16_v17 = vld [vmem:[%s316_s0 + $0x8] sm:$0xff]  ;;  %s121_s23 = sshll.u32 %s199_s1, 4  ;;  %s200_s0 = smov 128   ;;  %s122_s23 = int_to_ptr.vmem [resolvable:$true] %s121_s23 }
   0x9   :  { %v172_v18 = vld [vmem:[%s318_s2] ss:$0 sm:$0xff] }
   0xa   :  { %137 = vmatpush.xpose.msk.msra.mxu0 %vm37_vm0, %v30_v2  ;;  %155 = vmatpush.xpose.msk.msra.mxu1 %vm37_vm0, %v30_v2 }
   0xe   :  { %138 = vmatpush.xpose.msk.msra.mxu0 %vm37_vm0, %v29_v3  ;;  %156 = vmatpush.xpose.msk.msra.mxu1 %vm37_vm0, %v29_v3 }
  0x12   :  { %139 = vmatpush.xpose.msk.msra.mxu0 %vm37_vm0, %v28_v4  ;;  %157 = vmatpush.xpose.msk.msra.mxu1 %vm37_vm0, %v28_v4 }
  0x16   :  { %140 = vmatpush.xpose.msk.msra.mxu0 %vm37_vm0, %v27_v5  ;;  %158 = vmatpush.xpose.msk.msra.mxu1 %vm37_vm0, %v27_v5 }
  0x1a   :  { %141 = vmatpush.xpose.msk.msra.mxu0 %vm37_vm0, %v26_v6  ;;  %159 = vmatpush.xpose.msk.msra.mxu1 %vm37_vm0, %v26_v6 }
  0x1e   :  { %142 = vmatpush.xpose.msk.msra.mxu0 %vm37_vm0, %v25_v7  ;;  %160 = vmatpush.xpose.msk.msra.mxu1 %vm37_vm0, %v25_v7 }
  0x22   :  { %143 = vmatpush.xpose.msk.msra.mxu0 %vm37_vm0, %v24_v8  ;;  %161 = vmatpush.xpose.msk.msra.mxu1 %vm37_vm0, %v24_v8 }
  0x26   :  { %144 = vmatpush.xpose.msk.msra.mxu0 %vm37_vm0, %v23_v9  ;;  %162 = vmatpush.xpose.msk.msra.mxu1 %vm37_vm0, %v23_v9 }
  0x2a   :  { %145 = vmatpush.xpose.msk.msra.mxu0 %vm37_vm0, %v22_v10  ;;  %163 = vmatpush.xpose.msk.msra.mxu1 %vm37_vm0, %v22_v10 }
  0x2e   :  { %146 = vmatpush.xpose.msk.msra.mxu0 %vm37_vm0, %v21_v11  ;;  %164 = vmatpush.xpose.msk.msra.mxu1 %vm37_vm0, %v21_v11 }
  0x32   :  { %147 = vmatpush.xpose.msk.msra.mxu0 %vm37_vm0, %v20_v12  ;;  %165 = vmatpush.xpose.msk.msra.mxu1 %vm37_vm0, %v20_v12 }
  0x36   :  { %148 = vmatpush.xpose.msk.msra.mxu0 %vm37_vm0, %v19_v13  ;;  %166 = vmatpush.xpose.msk.msra.mxu1 %vm37_vm0, %v19_v13 }
  0x3a   :  { %149 = vmatpush.xpose.msk.msra.mxu0 %vm37_vm0, %v18_v14  ;;  %167 = vmatpush.xpose.msk.msra.mxu1 %vm37_vm0, %v18_v14 }
  0x3e   :  { %150 = vmatpush.xpose.msk.msra.mxu0 %vm37_vm0, %v17_v15  ;;  %168 = vmatpush.xpose.msk.msra.mxu1 %vm37_vm0, %v17_v15 }
  0x41   :  { %151 = vmatmul.msk.f32.vlgmr.msra.gmra.mxu0 %vm37_vm0, %v15_v16  ;;  %152 = vmatmul.msk.f32.vlgmr.msra.gmra.mxu1 %vm37_vm0, %v16_v17 }
  0xbe   :  { %v109_v19 = vpop.f32.mrf.mxu0  ;;  %v112_v20 = vpop.f32.mrf.mxu1 }
  0xbf   :  { %v110_v21 = vadd.f32 %v172_v18, %v109_v19  ;;  %v113_v22 = vadd.f32 %v172_v18, %v112_v20 }
  0xc1   :  { %115 = vst [vmem:[#allocation2] sm:$0xff] %v110_v21 }
  0xc2   :  { %116 = vst [vmem:[#allocation2 + $0x8] sm:$0xff] %v113_v22 }
  0xc3   :  { %129 = dma.vmem_to_hbm [thread:$0]  %s122_s23, 256, %s124_s26, [#allocation3], %s200_s0, %s200_s0, %s201_s27  }
  0xc4   :  { %197 = dma.done.wait [#allocation3], 256  }
  0xc5   :  { %198 = vsyncadd [#allocation3], 4294967040 }
  0xc6   :  { %134 = vsyncpa [#allocation3], 1 }

</bundles_post_ra>
